<compile_context>
chip_gen: v7x
topology: tpu7x:2x2x1
jax: 0.10.0
libtpu: 0.0.40
codegen_flags: <defaults>
</compile_context>

<pallas_src>
import jax
import jax.numpy as jnp
from jax.experimental import pallas as pl
from jax.experimental.pallas import tpu as pltpu

NN = 40
LANE = 128
MAX_TB = 4096  # beyond ~1024-4096 lanes the (40, TB) temps spill / vst-bind on v5e


def mlp_kernel(x_ref,
               w1_ref, b1_ref,
               w2_ref, b2_ref,
               w3_ref, b3_ref,
               w4_ref, b4_ref,
               w5_ref, b5_ref,
               o_ref):
    """Whole 5-layer MLP on one (features, TB) tile.

    x_ref : (1, TB)      w1: (NN, 1)   b1: (NN, 1)
    hidden: (NN, TB)     w2..w4: (NN, NN), b2..b4: (NN, 1)
    o_ref : (1, TB)      w5: (NN, 1)   b5: (1, 1) [always f32]
    Compute dtype is taken from the weights (f32 or bf16).
    """
    cdtype = w1_ref.dtype
    x = x_ref[...].astype(cdtype)                                 # (1, TB)

    # Layer 1 (in_features = 1): pure VPU broadcast multiply-add, no MXU.
    h = jnp.tanh(w1_ref[...] * x + b1_ref[...])                   # (NN, TB)

    # Layers 2-4: 40x40 MXU matmuls with f32 accumulation; bias add + tanh in
    # the compute dtype (bf16 on v6e/v7x halves the EUP cost, which binds here).
    for w_ref, b_ref in ((w2_ref, b2_ref), (w3_ref, b3_ref), (w4_ref, b4_ref)):
        acc = jnp.dot(w_ref[...], h, preferred_element_type=jnp.float32)
        h = jnp.tanh(acc.astype(cdtype) + b_ref[...])             # (NN, TB)

    # Layer 5 (out_features = 1): elementwise multiply + f32 cross-sublane reduce
    # over the 40-feature axis instead of a degenerate M=1 MXU call.
    prod = (w5_ref[...] * h).astype(jnp.float32)                  # (NN, TB)
    out = jnp.sum(prod, axis=0, keepdims=True) + b5_ref[...]      # (1, TB) f32
    o_ref[...] = out.astype(o_ref.dtype)


def init_linear(key, fan_in, fan_out):
    # PyTorch nn.Linear default init: U(-1/sqrt(fan_in), 1/sqrt(fan_in)),
    # weight stored PyTorch-style (out, in).
    kw, kb = jax.random.split(key)
    bound = 1.0 / jnp.sqrt(jnp.float32(fan_in))
    w = jax.random.uniform(kw, (fan_out, fan_in), jnp.float32, -bound, bound)
    b = jax.random.uniform(kb, (fan_out,), jnp.float32, -bound, bound)
    return w, b


def make_params(key):
    dims = [(1, NN), (NN, NN), (NN, NN), (NN, NN), (NN, 1)]
    keys = jax.random.split(key, len(dims))
    return [init_linear(k, fin, fout) for k, (fin, fout) in zip(keys, dims)]


def _pick_tile(batch, tb):
    """Lane tile: multiple of 128, <= min(tb, MAX_TB), and small enough that any
    batch padding to >= 256 lanes yields >= 2 grid steps (v7x dual-TC)."""
    min_padded = pl.cdiv(batch, LANE) * LANE
    tb_cap = max(LANE, (min(tb, MAX_TB) // LANE) * LANE)
    tb_eff = min(tb_cap, min_padded)
    if min_padded >= 2 * LANE:
        half = pl.cdiv(min_padded // 2, LANE) * LANE
        tb_eff = min(tb_eff, half)
    padded = pl.cdiv(batch, tb_eff) * tb_eff
    return tb_eff, padded


def net_forward(x, params, *, tb=2048, use_bf16=False):
    """x: (batch, 1) float32 -> (batch, 1) float32."""
    batch = x.shape[0]
    tb_eff, padded = _pick_tile(batch, tb)
    grid = (padded // tb_eff,)

    cdtype = jnp.bfloat16 if use_bf16 else jnp.float32

    # Transpose to (1, batch), zero-pad the lane axis (padding sliced off after
    # the kernel), cast once to the compute dtype (halves input DMA for bf16).
    xt = jnp.zeros((1, padded), jnp.float32).at[0, :batch].set(x[:, 0])
    xt = xt.astype(cdtype)

    (w1, b1), (w2, b2), (w3, b3), (w4, b4), (w5, b5) = params
    # Cast weights/biases to the compute dtype ONCE here (not per grid step);
    # b5 stays f32 so the final layer-5 sum/output path is full precision.
    flat = [
        w1.astype(cdtype), b1.reshape(NN, 1).astype(cdtype),
        w2.astype(cdtype), b2.reshape(NN, 1).astype(cdtype),
        w3.astype(cdtype), b3.reshape(NN, 1).astype(cdtype),
        w4.astype(cdtype), b4.reshape(NN, 1).astype(cdtype),
        w5.reshape(NN, 1).astype(cdtype), b5.reshape(1, 1),      # b5: (1,1) f32
    ]

    # Activations: batch on lanes, tiled along the grid.
    in_specs = [pl.BlockSpec((1, tb_eff), lambda i: (0, i))]
    # Weights/biases: full-array blocks with a constant index_map -> DMA'd into
    # VMEM once, resident across all grid steps.
    for p in flat:
        in_specs.append(pl.BlockSpec(p.shape, lambda i: (0, 0)))
    out_specs = pl.BlockSpec((1, tb_eff), lambda i: (0, i))

    param_bytes = int(sum(int(p.size) * p.dtype.itemsize for p in flat))
    act_bytes = int(padded * (xt.dtype.itemsize + 4))
    cost = pl.CostEstimate(
        flops=int(2 * padded * (NN + 3 * NN * NN + NN)),
        transcendentals=int(4 * NN * padded),
        bytes_accessed=act_bytes + param_bytes,
    )

    out_t = pl.pallas_call(
        mlp_kernel,
        out_shape=jax.ShapeDtypeStruct((1, padded), jnp.float32),
        grid_spec=pl.GridSpec(grid=grid, in_specs=in_specs, out_specs=out_specs),
        compiler_params=pltpu.CompilerParams(
            dimension_semantics=("parallel",)),
        cost_estimate=cost,
    )(xt, *flat)

    return out_t[0, :batch].reshape(batch, 1)


def net_forward_ref(x, params):
    h = x
    for i, (w, b) in enumerate(params):
        h = h @ w.T + b
        if i < len(params) - 1:
            h = jnp.tanh(h)
    return h


if __name__ == "__main__":
    key = jax.random.PRNGKey(0)
    kparam, kx, kx2 = jax.random.split(key, 3)

    params = make_params(kparam)
    # ODE parameters of the module (not used in forward); kept for parity.
    m = jnp.ones((1,), jnp.float32)
    k = jnp.ones((1,), jnp.float32)

    # Small batch: single grid step.
    batch = 8
    x = jax.random.uniform(kx, (batch, 1), jnp.float32, 0.0, 1.0)

    out = jax.block_until_ready(net_forward(x, params))          # f32 path
    ref = net_forward_ref(x, params)
    assert out.shape == (batch, 1)
    assert jnp.allclose(out, ref, atol=1e-5, rtol=1e-5)

    # Larger batch: exercises lane padding and the >=2-grid-step (dual-TC) path.
    batch2 = 300
    x2 = jax.random.uniform(kx2, (batch2, 1), jnp.float32, 0.0, 1.0)
    out2 = jax.block_until_ready(net_forward(x2, params))
    ref2 = net_forward_ref(x2, params)
    assert out2.shape == (batch2, 1)
    assert jnp.allclose(out2, ref2, atol=1e-5, rtol=1e-5)

    # bf16 activation/matmul path (v6e/v7x EUP/MXU throughput lever); looser
    # tolerance documented against end-to-end bf16 activations.
    out_bf16 = jax.block_until_ready(net_forward(x, params, use_bf16=True))
    assert jnp.allclose(out_bf16, ref, atol=3e-2, rtol=3e-2)

    print("KERNEL_OK")
</pallas_src>

<mosaic_0001>
module attributes {stable_mosaic.version = 11 : i64} {
  func.func @mlp_kernel(%arg0: i32, %arg1: memref<1x128xf32, #tpu.memory_space<vmem>>, %arg2: memref<40x1xf32, #tpu.memory_space<vmem>>, %arg3: memref<40x1xf32, #tpu.memory_space<vmem>>, %arg4: memref<40x40xf32, #tpu.memory_space<vmem>>, %arg5: memref<40x1xf32, #tpu.memory_space<vmem>>, %arg6: memref<40x40xf32, #tpu.memory_space<vmem>>, %arg7: memref<40x1xf32, #tpu.memory_space<vmem>>, %arg8: memref<40x40xf32, #tpu.memory_space<vmem>>, %arg9: memref<40x1xf32, #tpu.memory_space<vmem>>, %arg10: memref<40x1xf32, #tpu.memory_space<vmem>>, %arg11: memref<1x1xf32, #tpu.memory_space<vmem>>, %arg12: memref<1x128xf32, #tpu.memory_space<vmem>>) attributes {dimension_semantics = [#tpu.dimension_semantics<parallel>], iteration_bounds = array<i64: 1>, scalar_prefetch = 0 : i64, scratch_operands = 0 : i64, tpu.core_type = #tpu.core_type<tc>, window_params = [{transform_indices = @transform_0, window_bounds = array<i64: 1, 128>}, {pipeline_mode = #tpu.pipeline_mode<synchronous>, transform_indices = @transform_1, window_bounds = array<i64: 40, 1>}, {pipeline_mode = #tpu.pipeline_mode<synchronous>, transform_indices = @transform_2, window_bounds = array<i64: 40, 1>}, {pipeline_mode = #tpu.pipeline_mode<synchronous>, transform_indices = @transform_3, window_bounds = array<i64: 40, 40>}, {pipeline_mode = #tpu.pipeline_mode<synchronous>, transform_indices = @transform_4, window_bounds = array<i64: 40, 1>}, {pipeline_mode = #tpu.pipeline_mode<synchronous>, transform_indices = @transform_5, window_bounds = array<i64: 40, 40>}, {pipeline_mode = #tpu.pipeline_mode<synchronous>, transform_indices = @transform_6, window_bounds = array<i64: 40, 1>}, {pipeline_mode = #tpu.pipeline_mode<synchronous>, transform_indices = @transform_7, window_bounds = array<i64: 40, 40>}, {pipeline_mode = #tpu.pipeline_mode<synchronous>, transform_indices = @transform_8, window_bounds = array<i64: 40, 1>}, {pipeline_mode = #tpu.pipeline_mode<synchronous>, transform_indices = @transform_9, window_bounds = array<i64: 40, 1>}, {pipeline_mode = #tpu.pipeline_mode<synchronous>, transform_indices = @transform_10, window_bounds = array<i64: 1, 1>}, {transform_indices = @transform_11, window_bounds = array<i64: 1, 128>}]} {
    %c0 = arith.constant 0 : index
    %c0_0 = arith.constant 0 : index
    %0 = vector.load %arg1[%c0, %c0_0] : memref<1x128xf32, #tpu.memory_space<vmem>>, vector<1x128xf32>
    %c0_1 = arith.constant 0 : index
    %c0_2 = arith.constant 0 : index
    %1 = vector.load %arg2[%c0_1, %c0_2] : memref<40x1xf32, #tpu.memory_space<vmem>>, vector<40x1xf32>
    %2 = vector.broadcast %1 : vector<40x1xf32> to vector<40x128xf32>
    %3 = vector.broadcast %0 : vector<1x128xf32> to vector<40x128xf32>
    %4 = arith.mulf %2, %3 : vector<40x128xf32>
    %c0_3 = arith.constant 0 : index
    %c0_4 = arith.constant 0 : index
    %5 = vector.load %arg3[%c0_3, %c0_4] : memref<40x1xf32, #tpu.memory_space<vmem>>, vector<40x1xf32>
    %6 = vector.broadcast %5 : vector<40x1xf32> to vector<40x128xf32>
    %7 = arith.addf %4, %6 : vector<40x128xf32>
    %8 = math.tanh %7 : vector<40x128xf32>
    %c0_5 = arith.constant 0 : index
    %c0_6 = arith.constant 0 : index
    %9 = vector.load %arg4[%c0_5, %c0_6] : memref<40x40xf32, #tpu.memory_space<vmem>>, vector<40x40xf32>
    %cst = arith.constant dense<0.000000e+00> : vector<40x128xf32>
    %10 = tpu.matmul %9, %8, %cst {dimension_numbers = #tpu.dot_dimension_numbers<[1], [0], [0], [1], [0, 0, 1, 1], [], []>} : vector<40x40xf32>, vector<40x128xf32>, vector<40x128xf32> -> vector<40x128xf32>
    %c0_7 = arith.constant 0 : index
    %c0_8 = arith.constant 0 : index
    %11 = vector.load %arg5[%c0_7, %c0_8] : memref<40x1xf32, #tpu.memory_space<vmem>>, vector<40x1xf32>
    %12 = vector.broadcast %11 : vector<40x1xf32> to vector<40x128xf32>
    %13 = arith.addf %10, %12 : vector<40x128xf32>
    %14 = math.tanh %13 : vector<40x128xf32>
    %c0_9 = arith.constant 0 : index
    %c0_10 = arith.constant 0 : index
    %15 = vector.load %arg6[%c0_9, %c0_10] : memref<40x40xf32, #tpu.memory_space<vmem>>, vector<40x40xf32>
    %cst_11 = arith.constant dense<0.000000e+00> : vector<40x128xf32>
    %16 = tpu.matmul %15, %14, %cst_11 {dimension_numbers = #tpu.dot_dimension_numbers<[1], [0], [0], [1], [0, 0, 1, 1], [], []>} : vector<40x40xf32>, vector<40x128xf32>, vector<40x128xf32> -> vector<40x128xf32>
    %c0_12 = arith.constant 0 : index
    %c0_13 = arith.constant 0 : index
    %17 = vector.load %arg7[%c0_12, %c0_13] : memref<40x1xf32, #tpu.memory_space<vmem>>, vector<40x1xf32>
    %18 = vector.broadcast %17 : vector<40x1xf32> to vector<40x128xf32>
    %19 = arith.addf %16, %18 : vector<40x128xf32>
    %20 = math.tanh %19 : vector<40x128xf32>
    %c0_14 = arith.constant 0 : index
    %c0_15 = arith.constant 0 : index
    %21 = vector.load %arg8[%c0_14, %c0_15] : memref<40x40xf32, #tpu.memory_space<vmem>>, vector<40x40xf32>
    %cst_16 = arith.constant dense<0.000000e+00> : vector<40x128xf32>
    %22 = tpu.matmul %21, %20, %cst_16 {dimension_numbers = #tpu.dot_dimension_numbers<[1], [0], [0], [1], [0, 0, 1, 1], [], []>} : vector<40x40xf32>, vector<40x128xf32>, vector<40x128xf32> -> vector<40x128xf32>
    %c0_17 = arith.constant 0 : index
    %c0_18 = arith.constant 0 : index
    %23 = vector.load %arg9[%c0_17, %c0_18] : memref<40x1xf32, #tpu.memory_space<vmem>>, vector<40x1xf32>
    %24 = vector.broadcast %23 : vector<40x1xf32> to vector<40x128xf32>
    %25 = arith.addf %22, %24 : vector<40x128xf32>
    %26 = math.tanh %25 : vector<40x128xf32>
    %c0_19 = arith.constant 0 : index
    %c0_20 = arith.constant 0 : index
    %27 = vector.load %arg10[%c0_19, %c0_20] : memref<40x1xf32, #tpu.memory_space<vmem>>, vector<40x1xf32>
    %28 = vector.broadcast %27 : vector<40x1xf32> to vector<40x128xf32>
    %29 = arith.mulf %28, %26 : vector<40x128xf32>
    %cst_21 = arith.constant dense<0.000000e+00> : vector<128xf32>
    %30 = vector.multi_reduction <add>, %29, %cst_21 [0] : vector<40x128xf32> to vector<128xf32>
    %31 = vector.shape_cast %30 : vector<128xf32> to vector<1x128xf32>
    %c0_22 = arith.constant 0 : index
    %c0_23 = arith.constant 0 : index
    %32 = vector.load %arg11[%c0_22, %c0_23] : memref<1x1xf32, #tpu.memory_space<vmem>>, vector<1x1xf32>
    %33 = vector.broadcast %32 : vector<1x1xf32> to vector<1x128xf32>
    %34 = arith.addf %31, %33 : vector<1x128xf32>
    %c0_24 = arith.constant 0 : index
    %c0_25 = arith.constant 0 : index
    %35 = vector.load %arg12[%c0_24, %c0_25] : memref<1x128xf32, #tpu.memory_space<vmem>>, vector<1x128xf32>
    tpu.vector_store %arg12[%c0_24, %c0_25], %34 {strides = array<i32>} : memref<1x128xf32, #tpu.memory_space<vmem>>, vector<1x128xf32>,
    return
  }
  func.func @transform_0(%arg0: i32) -> (i32, i32) {
    %c0_i32 = arith.constant 0 : i32
    %c0_i32_0 = arith.constant 0 : i32
    return %c0_i32, %arg0 : i32, i32
  }
  func.func @transform_1(%arg0: i32) -> (i32, i32) {
    %c0_i32 = arith.constant 0 : i32
    %c0_i32_0 = arith.constant 0 : i32
    %c0_i32_1 = arith.constant 0 : i32
    return %c0_i32, %c0_i32_0 : i32, i32
  }
  func.func @transform_2(%arg0: i32) -> (i32, i32) {
    %c0_i32 = arith.constant 0 : i32
    %c0_i32_0 = arith.constant 0 : i32
    %c0_i32_1 = arith.constant 0 : i32
    return %c0_i32, %c0_i32_0 : i32, i32
  }
  func.func @transform_3(%arg0: i32) -> (i32, i32) {
    %c0_i32 = arith.constant 0 : i32
    %c0_i32_0 = arith.constant 0 : i32
    %c0_i32_1 = arith.constant 0 : i32
    return %c0_i32, %c0_i32_0 : i32, i32
  }
  func.func @transform_4(%arg0: i32) -> (i32, i32) {
    %c0_i32 = arith.constant 0 : i32
    %c0_i32_0 = arith.constant 0 : i32
    %c0_i32_1 = arith.constant 0 : i32
    return %c0_i32, %c0_i32_0 : i32, i32
  }
  func.func @transform_5(%arg0: i32) -> (i32, i32) {
    %c0_i32 = arith.constant 0 : i32
    %c0_i32_0 = arith.constant 0 : i32
    %c0_i32_1 = arith.constant 0 : i32
    return %c0_i32, %c0_i32_0 : i32, i32
  }
  func.func @transform_6(%arg0: i32) -> (i32, i32) {
    %c0_i32 = arith.constant 0 : i32
    %c0_i32_0 = arith.constant 0 : i32
    %c0_i32_1 = arith.constant 0 : i32
    return %c0_i32, %c0_i32_0 : i32, i32
  }
  func.func @transform_7(%arg0: i32) -> (i32, i32) {
    %c0_i32 = arith.constant 0 : i32
    %c0_i32_0 = arith.constant 0 : i32
    %c0_i32_1 = arith.constant 0 : i32
    return %c0_i32, %c0_i32_0 : i32, i32
  }
  func.func @transform_8(%arg0: i32) -> (i32, i32) {
    %c0_i32 = arith.constant 0 : i32
    %c0_i32_0 = arith.constant 0 : i32
    %c0_i32_1 = arith.constant 0 : i32
    return %c0_i32, %c0_i32_0 : i32, i32
  }
  func.func @transform_9(%arg0: i32) -> (i32, i32) {
    %c0_i32 = arith.constant 0 : i32
    %c0_i32_0 = arith.constant 0 : i32
    %c0_i32_1 = arith.constant 0 : i32
    return %c0_i32, %c0_i32_0 : i32, i32
  }
  func.func @transform_10(%arg0: i32) -> (i32, i32) {
    %c0_i32 = arith.constant 0 : i32
    %c0_i32_0 = arith.constant 0 : i32
    %c0_i32_1 = arith.constant 0 : i32
    return %c0_i32, %c0_i32_0 : i32, i32
  }
  func.func @transform_11(%arg0: i32) -> (i32, i32) {
    %c0_i32 = arith.constant 0 : i32
    %c0_i32_0 = arith.constant 0 : i32
    return %c0_i32, %arg0 : i32, i32
  }
}

</mosaic_0001>

<bundles_post_ra>
// kernel: tpu_custom_call.1
= control target key start
LH: loop header
LB: loop body
LE: loop exit
PB: predicated region body
PF: predicated region fallthrough
CT: control target
= control target key end

     0   :  { %s1121_s0 = inlined_call_operand.vmem [shape: f32[1,128], index: 0, kind: input, shape index: {}]   ;;  %s1122_s1 = inlined_call_operand.vmem [shape: f32[40,1], index: 1, kind: input, shape index: {}]   ;;  %s1123_s2 = inlined_call_operand.vmem [shape: f32[40,1], index: 2, kind: input, shape index: {}]   ;;  %s1124_s3 = inlined_call_operand.vmem [shape: f32[40,40], index: 3, kind: input, shape index: {}]   ;;  %s1125_s4 = inlined_call_operand.vmem [shape: f32[40,1], index: 4, kind: input, shape index: {}]   ;;  %s1126_s5 = inlined_call_operand.vmem [shape: f32[40,40], index: 5, kind: input, shape index: {}]   ;;  %s1127_s6 = inlined_call_operand.vmem [shape: f32[40,1], index: 6, kind: input, shape index: {}]   ;;  %s1128_s7 = inlined_call_operand.vmem [shape: f32[40,40], index: 7, kind: input, shape index: {}]   ;;  %s1129_s8 = inlined_call_operand.vmem [shape: f32[40,1], index: 8, kind: input, shape index: {}]   ;;  %s1130_s9 = inlined_call_operand.vmem [shape: f32[40,1], index: 9, kind: input, shape index: {}]   ;;  %s1131_s10 = inlined_call_operand.<no memory space> [shape: f32[1,1], index: 10, kind: input, shape index: {}]   ;;  %s1132_s11 = inlined_call_operand.hbm [shape: f32[1,128], index: 11, kind: output, shape index: {}]  }
   0x1   :  { %v16_v0 = vstv %s1131_s10 }
   0x2   :  { %17 = vst [vmem:[#allocation2] sm:$0x1] %v16_v0 }
   0x3   :  { %v83_v1 = vld [vmem:[%s1123_s2] sm:$0xff]  ;;  %v846_v3 = vmov 0   ;;  %v84_v4 = vld [vmem:[%s1123_s2 + $0x8] sm:$0xff]  ;;  %v45_v6 = vld [vmem:[%s1122_s1 + $0x18] sm:$0xff] }
   0x4   :  { %v42_v2 = vld [vmem:[%s1122_s1] sm:$0xff]  ;;  %781 = vset.pattern.permute.xlu1 %v846_v3  ;;  %780 = vset.pattern.permute.xlu0 %v846_v3  ;;  %v43_v5 = vld [vmem:[%s1122_s1 + $0x8] sm:$0xff]  ;;  %v44_v7 = vld [vmem:[%s1122_s1 + $0x10] sm:$0xff] }
   0x5   :  { %90 = vperm.xlu1 %781, %v83_v1   ;;  %49 = vperm.xlu0 %780, %v42_v2  }
   0x9   :  { %95 = vperm.xlu1 %781, %v84_v4   ;;  %54 = vperm.xlu0 %780, %v43_v5  }
   0xd   :  { %64 = vperm.xlu1 %781, %v45_v6   ;;  %59 = vperm.xlu0 %780, %v44_v7  }
   0xe   :  { %18 = vsyncpa [#allocation4], 0  ;;  %v86_v8 = vld [vmem:[%s1123_s2 + $0x18] sm:$0xff]  ;;  %v85_v9 = vld [vmem:[%s1123_s2 + $0x10] sm:$0xff]  ;;  %v847_v16 = vmov 0.0|0.0   ;;  %vm848_vm0 = vmmov 0  }
   0xf   :  { %v87_v10 = vld [vmem:[%s1123_s2 + $0x20] sm:$0xff]  ;;  %v129_v12 = vld [vmem:[%s1125_s4 + $0x8] sm:$0xff]  ;;  %v131_v14 = vld [vmem:[%s1125_s4 + $0x18] sm:$0xff]  ;;  %751 = vmatprep.subr.bf16.mxu0 %v847_v16  ;;  %769 = vmatprep.subr.bf16.mxu1 %v847_v16  ;;  %v849_v21 = vmov 0.0   ;;  %vm158_vm1 = vcmask 326656  }
  0x10   :  { %v46_v11 = vld [vmem:[%s1122_s1 + $0x20] sm:$0xff]  ;;  %v130_v15 = vld [vmem:[%s1125_s4 + $0x10] sm:$0xff]  ;;  %v275_v20 = vld [vmem:[%s1127_s6 + $0x8] sm:$0xff]  ;;  %686 = vmatprep.mubr.msk.f32.mxu0 %vm848_vm0, %v849_v21  ;;  %695 = vmatprep.mubr.msk.f32.mxu1 %vm848_vm0, %v849_v21 }
  0x11   :  { %105 = vperm.xlu1 %781, %v86_v8   ;;  %100 = vperm.xlu0 %780, %v85_v9   ;;  %v128_v13 = vld [vmem:[%s1125_s4] sm:$0xff]  ;;  %v276_v19 = vld [vmem:[%s1127_s6 + $0x10] sm:$0xff]  ;;  %v277_v23 = vld [vmem:[%s1127_s6 + $0x18] sm:$0xff] }
  0x12   :  { %v274_v17 = vld [vmem:[%s1127_s6] sm:$0xff]  ;;  %v420_v24 = vld [vmem:[%s1129_s8 + $0x8] sm:$0xff]  ;;  %v422_v26 = vld [vmem:[%s1129_s8 + $0x18] sm:$0xff] }
  0x13   :  { %v132_v18 = vld [vmem:[%s1125_s4 + $0x20] sm:$0xff]  ;;  %v421_v27 = vld [vmem:[%s1129_s8 + $0x10] sm:$0xff]  ;;  %v560_v31 = vld [vmem:[%s1130_s9 + $0x8] sm:$0xff] }
  0x14   :  { %v278_v22 = vld [vmem:[%s1127_s6 + $0x20] sm:$0xff]  ;;  %v561_v30 = vld [vmem:[%s1130_s9 + $0x10] sm:$0xff]  ;;  %v562_v33 = vld [vmem:[%s1130_s9 + $0x18] sm:$0xff] }
  0x15   :  { %110 = vperm.xlu1 %781, %v87_v10   ;;  %69 = vperm.xlu0 %780, %v46_v11   ;;  %v419_v25 = vld [vmem:[%s1129_s8] sm:$0xff]  ;;  %v126_v0 = vld [vmem:[%s1124_s3 + $0x18] sm:$0xff]  ;;  %v124_v1 = vld [vmem:[%s1124_s3 + $0x8] sm:$0xff] }
  0x16   :  { %v559_v28 = vld [vmem:[%s1130_s9] sm:$0xff]  ;;  %v125_v3 = vld [vmem:[%s1124_s3 + $0x10] sm:$0xff] }
  0x17   :  { %v423_v29 = vld [vmem:[%s1129_s8 + $0x20] sm:$0xff] }
  0x18   :  { %v563_v32 = vld [vmem:[%s1130_s9 + $0x20] sm:$0xff] }
  0x19   :  { %140 = vperm.xlu1 %781, %v129_v12   ;;  %135 = vperm.xlu0 %780, %v128_v13   ;;  %v604_v34 = vld [vmem:[#allocation2] sm:$0x1] }
  0x1a   :  { %v630_v35 = vld [vmem:[%s1121_s0] ss:$0 sm:$0xff] }
  0x1b   :  { %v123_v63 = vld [vmem:[%s1124_s3] sm:$0xff] }
  0x1c   :  { %v127_v2 = vld [vmem:[%s1124_s3 + $0x20] sm:$0xff] }
  0x1d   :  { %150 = vperm.xlu1 %781, %v131_v14   ;;  %145 = vperm.xlu0 %780, %v130_v15  }
  0x21   :  { %281 = vperm.xlu1 %781, %v274_v17   ;;  %155 = vperm.xlu0 %780, %v132_v18  }
  0x25   :  { %291 = vperm.xlu1 %781, %v276_v19   ;;  %286 = vperm.xlu0 %780, %v275_v20  }
  0x29   :  { %301 = vperm.xlu1 %781, %v278_v22   ;;  %296 = vperm.xlu0 %780, %v277_v23  }
  0x2d   :  { %431 = vperm.xlu1 %781, %v420_v24   ;;  %426 = vperm.xlu0 %780, %v419_v25  }
  0x31   :  { %441 = vperm.xlu1 %781, %v422_v26   ;;  %436 = vperm.xlu0 %780, %v421_v27  }
  0x35   :  { %566 = vperm.xlu1 %781, %v559_v28   ;;  %446 = vperm.xlu0 %780, %v423_v29  }
  0x39   :  { %576 = vperm.xlu1 %781, %v561_v30   ;;  %571 = vperm.xlu0 %780, %v560_v31  }
  0x3d   :  { %586 = vperm.xlu1 %781, %v563_v32   ;;  %581 = vperm.xlu0 %780, %v562_v33   ;;  %v269_v32 = vld [vmem:[%s1126_s5] sm:$0xff] }
  0x41   :  { %607 = vperm.xlu0 %780, %v604_v34   ;;  %v270_v34 = vld [vmem:[%s1126_s5 + $0x8] sm:$0xff] }
  0x84   :  { %v91_v36 = vpop.permute.xlu1 %90  ;;  %v50_v37 = vpop.permute.xlu0 %49 }
  0x85   :  { %v78_v38 = vmul.f32 %v630_v35, %v50_v37  ;;  %v273_v37 = vld [vmem:[%s1126_s5 + $0x20] sm:$0xff] }
  0x87   :  { %v113_v39 = vadd.f32 %v91_v36, %v78_v38  ;;  %v272_v36 = vld [vmem:[%s1126_s5 + $0x18] sm:$0xff] }
  0x88   :  { %v96_v40 = vpop.permute.xlu1 %95  ;;  %v55_v41 = vpop.permute.xlu0 %54 }
  0x89   :  { %v79_v42 = vmul.f32 %v630_v35, %v55_v41  ;;  %782 = vtanh.f32 %v113_v39 }
  0x8b   :  { %v114_v43 = vadd.f32 %v96_v40, %v79_v42 }
  0x8c   :  { %v65_v44 = vpop.permute.xlu1 %64  ;;  %v60_v45 = vpop.permute.xlu0 %59 }
  0x8d   :  { %784 = vtanh.f32 %v114_v43  ;;  %v81_v46 = vmul.f32 %v630_v35, %v65_v44  ;;  %v80_v47 = vmul.f32 %v630_v35, %v60_v45 }
  0x90   :  { %v106_v48 = vpop.permute.xlu1 %105  ;;  %v101_v49 = vpop.permute.xlu0 %100 }
  0x91   :  { %v116_v50 = vadd.f32 %v106_v48, %v81_v46  ;;  %v115_v51 = vadd.f32 %v101_v49, %v80_v47 }
  0x93   :  { %786 = vtanh.f32 %v116_v50  ;;  %v783_v54 = vpop.eup %782 }
  0x94   :  { %788 = vtanh.f32 %v115_v51  ;;  %v70_v52 = vpop.permute.xlu0 %69  ;;  %v111_v55 = vpop.permute.xlu1 %110 }
  0x95   :  { %v82_v53 = vmul.f32 %v630_v35, %v70_v52  ;;  %v271_v35 = vld [vmem:[%s1126_s5 + $0x10] sm:$0xff] }
  0x97   :  { %v785_v56 = vpop.eup %784  ;;  %v117_v57 = vadd.f32 %v111_v55, %v82_v53 }
  0x98   :  { %v752_v58 = vpack.c.bf16 %v785_v56, %v783_v54  ;;  %v141_v4 = vpop.permute.xlu1 %140  ;;  %v136_v5 = vpop.permute.xlu0 %135 }
  0x99   :  { %790 = vtanh.f32 %v117_v57 }
  0x9a   :  { %753 = vmatpush3.bf16.msra.mxu0 %v752_v58  ;;  %772 = vmatpush3.bf16.msra.mxu1 %v752_v58 }
  0x9b   :  { %754 = vmatprep.subr.bf16.mxu0 %v847_v16  ;;  %770 = vmatprep.subr.bf16.mxu1 %v847_v16 }
  0x9c   :  { %v151_v11 = vpop.permute.xlu1 %150  ;;  %v146_v18 = vpop.permute.xlu0 %145 }
  0x9d   :  { %v787_v59 = vpop.eup %786 }
  0x9e   :  { %v789_v60 = vpop.eup %788 }
  0x9f   :  { %v755_v61 = vpack.c.bf16 %v787_v59, %v789_v60 }
  0xa0   :  { %v156_v24 = vpop.permute.xlu0 %155  ;;  %v282_v39 = vpop.permute.xlu1 %281 }
  0xa1   :  { %756 = vmatpush3.bf16.msra.mxu0 %v755_v61  ;;  %773 = vmatpush3.bf16.msra.mxu1 %v755_v61 }
  0xa2   :  { %684 = vmatprep.subr.mxu0 %v849_v21  ;;  %771 = vmatprep.subr.mxu1 %v849_v21 }
  0xa3   :  { %v791_v62 = vpop.eup %790 }
  0xa4   :  { %v287_v42 = vpop.permute.xlu0 %286  ;;  %v292_v47 = vpop.permute.xlu1 %291 }
  0xa5   :  { %685 = vmatpush3.msra.mxu0 %v791_v62  ;;  %774 = vmatpush3.msra.mxu1 %v791_v62 }
  0xa6   :  { %687 = vmatmul.mubr.msk.f32.vlgmr.msra.gmra.mrb[0].mxu0 %vm158_vm1, %v123_v63  ;;  %696 = vmatmul.mubr.msk.f32.vlgmr.msra.gmra.mrb[0].mxu1 %vm158_vm1, %v126_v0  ;;  %v414_v0 = vld [vmem:[%s1128_s7] sm:$0xff] }
  0xa7   :  { %689 = vmatprep.mubr.msk.f32.mxu0 %vm848_vm0, %v849_v21  ;;  %698 = vmatprep.mubr.msk.f32.mxu1 %vm848_vm0, %v849_v21 }
  0xa8   :  { %757 = vmatprep.subr.bf16.mxu1 %v847_v16  ;;  %763 = vmatprep.subr.bf16.mxu0 %v847_v16  ;;  %v297_v50 = vpop.permute.xlu0 %296  ;;  %v302_v55 = vpop.permute.xlu1 %301 }
  0xaa   :  { %690 = vmatmul.mubr.msk.f32.gmra.mrb[2].mxu0 %vm158_vm1, %v124_v1  ;;  %699 = vmatmul.mubr.msk.f32.gmra.mrb[2].mxu1 %vm158_vm1, %v127_v2  ;;  %v416_v2 = vld [vmem:[%s1128_s7 + $0x10] sm:$0xff] }
  0xab   :  { %692 = vmatprep.mubr.msk.f32.mxu0 %vm848_vm0, %v849_v21  ;;  %711 = vmatprep.mubr.msk.f32.mxu1 %vm848_vm0, %v849_v21 }
  0xae   :  { %693 = vmatmul.mubr.msk.f32.gmra.mrb[4].mxu0 %vm158_vm1, %v125_v3  ;;  %v417_v3 = vld [vmem:[%s1128_s7 + $0x18] sm:$0xff] }
  0xaf   :  { %736 = vmatprep.mubr.msk.f32.mxu0 %vm848_vm0, %v849_v21 }
 0x179   :  { %v240_v6 = vpop.f32.mrb[0].mxu0  ;;  %v255_v7 = vpop.f32.mrb[0].mxu1 }
 0x17a   :  { %v688_v8 = vpop.f32.mrb[1].mxu0  ;;  %v697_v9 = vpop.f32.mrb[1].mxu1  ;;  %v241_v10 = vadd.f32 %v240_v6, %v136_v5  ;;  %v256_v19 = vadd.f32 %v255_v7, %v151_v11 }
 0x17b   :  { %v427_v5 = vpop.permute.xlu0 %426  ;;  %v432_v9 = vpop.permute.xlu1 %431 }
 0x17c   :  { %792 = vtanh.f32 %v241_v10 }
 0x17d   :  { %v245_v12 = vpop.f32.mrb[2].mxu0  ;;  %v260_v13 = vpop.f32.mrb[2].mxu1 }
 0x17e   :  { %v246_v14 = vadd.f32 %v245_v12, %v141_v4  ;;  %v691_v15 = vpop.f32.mrb[3].mxu0  ;;  %v700_v17 = vpop.f32.mrb[3].mxu1  ;;  %v261_v25 = vadd.f32 %v260_v13, %v156_v24  ;;  %v418_v4 = vld [vmem:[%s1128_s7 + $0x20] sm:$0xff] }
 0x17f   :  { %v437_v11 = vpop.permute.xlu0 %436  ;;  %v442_v15 = vpop.permute.xlu1 %441 }
 0x180   :  { %794 = vtanh.f32 %v246_v14 }
 0x181   :  { %v250_v20 = vpop.f32.mrb[4].mxu0  ;;  %796 = vtanh.f32 %v256_v19 }
 0x182   :  { %v251_v22 = vadd.f32 %v250_v20, %v146_v18  ;;  %v694_v23 = vpop.f32.mrb[5].mxu0 }
 0x183   :  { %v447_v18 = vpop.permute.xlu0 %446  ;;  %v567_v24 = vpop.permute.xlu1 %566 }
 0x184   :  { %798 = vtanh.f32 %v251_v22 }
 0x185   :  { %800 = vtanh.f32 %v261_v25 }
 0x186   :  { %v793_v26 = vpop.eup %792 }
 0x18a   :  { %v795_v27 = vpop.eup %794 }
 0x18b   :  { %v758_v28 = vpack.c.bf16 %v795_v27, %v793_v26  ;;  %v797_v29 = vpop.eup %796  ;;  %v572_v27 = vpop.permute.xlu0 %571 }
 0x18d   :  { %759 = vmatpush3.bf16.msra.mxu1 %v758_v28 }
 0x18e   :  { %v799_v30 = vpop.eup %798  ;;  %760 = vmatprep.subr.bf16.mxu1 %v847_v16 }
 0x18f   :  { %v761_v31 = vpack.c.bf16 %v797_v29, %v799_v30  ;;  %v801_v33 = vpop.eup %800 }
 0x191   :  { %762 = vmatpush3.bf16.msra.mxu1 %v761_v31 }
 0x192   :  { %709 = vmatprep.subr.mxu1 %v849_v21 }
 0x195   :  { %710 = vmatpush3.msra.mxu1 %v801_v33 }
 0x196   :  { %712 = vmatmul.mubr.msk.f32.vlgmr.msra.gmra.mrb[4].mxu1 %vm158_vm1, %v269_v32 }
 0x197   :  { %714 = vmatprep.mubr.msk.f32.mxu1 %vm848_vm0, %v849_v21 }
 0x19a   :  { %715 = vmatmul.mubr.msk.f32.gmra.mrb[6].mxu1 %vm158_vm1, %v270_v34  ;;  %v577_v34 = vpop.permute.xlu1 %576 }
 0x19b   :  { %717 = vmatprep.mubr.msk.f32.mxu1 %vm848_vm0, %v849_v21 }
 0x19e   :  { %718 = vmatmul.mubr.msk.f32.gmra.mrb[8].mxu1 %vm158_vm1, %v271_v35 }
 0x19f   :  { %720 = vmatprep.mubr.msk.f32.mxu1 %vm848_vm0, %v849_v21 }
 0x1a2   :  { %721 = vmatmul.mubr.msk.f32.gmra.mrb[10].mxu1 %vm158_vm1, %v272_v36 }
 0x1a3   :  { %723 = vmatprep.mubr.msk.f32.mxu1 %vm848_vm0, %v849_v21 }
 0x1a6   :  { %724 = vmatmul.mubr.msk.f32.gmra.mrb[12].mxu1 %vm158_vm1, %v273_v37 }
 0x269   :  { %v385_v38 = vpop.f32.mrb[4].mxu1 }
 0x26a   :  { %v713_v40 = vpop.f32.mrb[5].mxu1  ;;  %v386_v41 = vadd.f32 %v385_v38, %v282_v39  ;;  %v582_v38 = vpop.permute.xlu0 %581 }
 0x26c   :  { %802 = vtanh.f32 %v386_v41 }
 0x26d   :  { %v390_v43 = vpop.f32.mrb[6].mxu1 }
 0x26e   :  { %v391_v44 = vadd.f32 %v390_v43, %v287_v42  ;;  %v716_v45 = vpop.f32.mrb[7].mxu1  ;;  %v587_v42 = vpop.permute.xlu1 %586 }
 0x270   :  { %804 = vtanh.f32 %v391_v44  ;;  %v610_v44 = vlaneseq }
 0x271   :  { %v395_v46 = vpop.f32.mrb[8].mxu1 }
 0x272   :  { %v719_v48 = vpop.f32.mrb[9].mxu1  ;;  %v396_v49 = vadd.f32 %v395_v46, %v292_v47  ;;  %v611_v47 = vshrl.u32 %v610_v44, 7 }
 0x274   :  { %806 = vtanh.f32 %v396_v49 }
 0x275   :  { %v400_v51 = vpop.f32.mrb[10].mxu1 }
 0x276   :  { %v401_v52 = vadd.f32 %v400_v51, %v297_v50  ;;  %v722_v53 = vpop.f32.mrb[11].mxu1  ;;  %v803_v54 = vpop.eup %802  ;;  %v612_v50 = vsub.s32 0, %v611_v47 }
 0x278   :  { %808 = vtanh.f32 %v401_v52  ;;  %v608_v52 = vpop.permute.xlu0 %607 }
 0x279   :  { %v405_v56 = vpop.f32.mrb[12].mxu1 }
 0x27a   :  { %v805_v57 = vpop.eup %804  ;;  %v406_v58 = vadd.f32 %v405_v56, %v302_v55  ;;  %v725_v59 = vpop.f32.mrb[13].mxu1 }
 0x27b   :  { %v764_v60 = vpack.c.bf16 %v805_v57, %v803_v54  ;;  %v613_v54 = vrot.slane %v608_v52, %v612_v50 }
 0x27c   :  { %810 = vtanh.f32 %v406_v58 }
 0x27d   :  { %765 = vmatpush3.bf16.msra.mxu0 %v764_v60 }
 0x27e   :  { %766 = vmatprep.subr.bf16.mxu0 %v847_v16  ;;  %v807_v61 = vpop.eup %806  ;;  %v415_v16 = vld [vmem:[%s1128_s7 + $0x8] sm:$0xff]  ;;  %s850_s7 = smov [#allocation3]  }
 0x27f   :  { %s622_s9 = sshll.u32 %s850_s7, 4  ;;  %s623_s9 = int_to_ptr.vmem [resolvable:$true] %s622_s9 }
 0x280   :  { %s822_s13 = scalar_lea.vmem %s623_s9, 16  ;;  %s826_s14 = scalar_lea.vmem %s623_s9, 32 }
 0x281   :  { %p823_p0 = scmp.ne.s32.totalorder %s623_s9, %s822_s13  ;;  %p827_p1 = scmp.lt.s32.totalorder %s623_s9, %s623_s9 }
 0x282   :  { %v809_v62 = vpop.eup %808  ;;  %p828_p2 = scmp.lt.s32.totalorder %s826_s14, %s822_s13 }
 0x283   :  { %v767_v63 = vpack.c.bf16 %v809_v62, %v807_v61 }
 0x284   :  { %p829_p3 = por %p828_p2, %p827_p1 }
 0x285   :  { %768 = vmatpush3.bf16.msra.mxu0 %v767_v63 }
 0x286   :  { %734 = vmatprep.subr.mxu0 %v849_v21  ;;  %v811_v1 = vpop.eup %810  ;;  %p830_p4 = pnand %p829_p3, %p823_p0 }
 0x289   :  { %735 = vmatpush3.msra.mxu0 %v811_v1 }
 0x28a   :  { %737 = vmatmul.mubr.msk.f32.vlgmr.msra.gmra.mrb[6].mxu0 %vm158_vm1, %v414_v0 }
 0x28b   :  { %739 = vmatprep.mubr.msk.f32.mxu0 %vm848_vm0, %v849_v21 }
 0x28e   :  { %740 = vmatmul.mubr.msk.f32.gmra.mrb[8].mxu0 %vm158_vm1, %v415_v16 }
 0x28f   :  { %742 = vmatprep.mubr.msk.f32.mxu0 %vm848_vm0, %v849_v21 }
 0x292   :  { %743 = vmatmul.mubr.msk.f32.gmra.mrb[10].mxu0 %vm158_vm1, %v416_v2 }
 0x293   :  { %745 = vmatprep.mubr.msk.f32.mxu0 %vm848_vm0, %v849_v21 }
 0x296   :  { %746 = vmatmul.mubr.msk.f32.gmra.mrb[12].mxu0 %vm158_vm1, %v417_v3 }
 0x297   :  { %748 = vmatprep.mubr.msk.f32.mxu0 %vm848_vm0, %v849_v21 }
 0x29a   :  { %749 = vmatmul.mubr.msk.f32.gmra.mrb[14].mxu0 %vm158_vm1, %v418_v4 }
 0x35d   :  { %v530_v6 = vpop.f32.mrb[6].mxu0 }
 0x35e   :  { %v531_v7 = vadd.f32 %v530_v6, %v427_v5  ;;  %v738_v8 = vpop.f32.mrb[7].mxu0 }
 0x360   :  { %812 = vtanh.f32 %v531_v7 }
 0x361   :  { %v535_v10 = vpop.f32.mrb[8].mxu0 }
 0x362   :  { %v536_v12 = vadd.f32 %v535_v10, %v432_v9  ;;  %v741_v13 = vpop.f32.mrb[9].mxu0 }
 0x364   :  { %814 = vtanh.f32 %v536_v12 }
 0x365   :  { %v540_v14 = vpop.f32.mrb[10].mxu0 }
 0x366   :  { %v541_v21 = vadd.f32 %v540_v14, %v437_v11  ;;  %v744_v17 = vpop.f32.mrb[11].mxu0 }
 0x368   :  { %816 = vtanh.f32 %v541_v21 }
 0x369   :  { %v545_v19 = vpop.f32.mrb[12].mxu0 }
 0x36a   :  { %v546_v20 = vadd.f32 %v545_v19, %v442_v15  ;;  %v747_v22 = vpop.f32.mrb[13].mxu0  ;;  %v813_v23 = vpop.eup %812 }
 0x36b   :  { %v589_v30 = vmul.f32 %v813_v23, %v567_v24 }
 0x36c   :  { %818 = vtanh.f32 %v546_v20 }
 0x36d   :  { %v550_v25 = vpop.f32.mrb[14].mxu0 }
 0x36e   :  { %v815_v26 = vpop.eup %814  ;;  %v551_v28 = vadd.f32 %v550_v25, %v447_v18  ;;  %v750_v29 = vpop.f32.mrb[15].mxu0 }
 0x36f   :  { %v590_v31 = vmul.f32 %v815_v26, %v572_v27 }
 0x370   :  { %820 = vtanh.f32 %v551_v28 }
 0x371   :  { %v594_v32 = vadd.f32 %v590_v31, %v589_v30 }
 0x372   :  { %v817_v33 = vpop.eup %816 }
 0x373   :  { %v591_v35 = vmul.f32 %v817_v33, %v577_v34 }
 0x375   :  { %v595_v36 = vadd.f32 %v594_v32, %v591_v35 }
 0x376   :  { %v819_v37 = vpop.eup %818 }
 0x377   :  { %v592_v39 = vmul.f32 %v819_v37, %v582_v38 }
 0x379   :  { %v596_v40 = vadd.f32 %v595_v36, %v592_v39 }
 0x37a   :  { %v821_v41 = vpop.eup %820 }
 0x37b   :  { %v593_v43 = vmul.f32 %v821_v41, %v587_v42 }
 0x37d   :  { %v597_v45 = vadd.f32 %v596_v40, %v593_v43 }
 0x37f   :  { %v598_v46 = vrot.slane %v597_v45, 4 }
 0x381   :  { %v599_v48 = vadd.f32 %v598_v46, %v597_v45 }
 0x383   :  { %v600_v49 = vrot.slane %v599_v48, 2 }
 0x385   :  { %v601_v51 = vadd.f32 %v600_v49, %v599_v48 }
 0x387   :  { %v602_v53 = vrot.slane %v601_v51, 1 }
 0x389   :  { %v603_v55 = vadd.f32 %v602_v53, %v601_v51 }
 0x38b   :  { %v614_v56 = vadd.f32 %v613_v54, %v603_v55 }
 0x38d   :  { %615 = vst [vmem:[#allocation3] sm:$0x1] %v614_v56 }
 0x38e   :  { %833 = shalt.err (!%p830_p4)
}
 0x38f   :  { %s834_s17 = scalar_lea.hbm %s1132_s11, 16 }
 0x390   :  { %p835_p5 = scmp.ne.s32.totalorder %s1132_s11, %s834_s17  ;;  %p838_p6 = scmp.lt.u32.totalorder %s834_s17, %s1132_s11 }
 0x392   :  { %p840_p7 = pnand %p838_p6, %p835_p5 }
 0x394   :  { %843 = shalt.err (!%p840_p7)
}
 0x395   :  { %625 = dma.vmem_to_hbm [thread:$0]  %s623_s9, 16, %s1132_s11, [#allocation4]  }
 0x396   :  { %844 = dma.done.wait [#allocation4], 16  }
 0x397   :  { %845 = vsyncadd [#allocation4], 4294967280 }
 0x398   :  { %629 = vsyncpa [#allocation4], 1 }

</bundles_post_ra>
